<compile_context>
chip_gen: v7x
topology: tpu7x:2x2x1
jax: 0.10.0
libtpu: 0.0.40
codegen_flags: <defaults>
</compile_context>

<pallas_src>
import functools

import jax
import jax.numpy as jnp
from jax.experimental import pallas as pl
from jax.experimental.pallas import tpu as pltpu


def _round_up(x, m):
    return ((x + m - 1) // m) * m


def _actor_kernel(x_ref, w1_ref, b1_ref, w2_ref, b2_ref, o_ref, *, bound):
    # fc: x @ W1 + b1, ReLU  (MXU matmul, f32 accumulation; VPU elementwise in f32)
    h = jnp.dot(x_ref[...], w1_ref[...], preferred_element_type=jnp.float32)
    h = jnp.maximum(h + b1_ref[...], 0.0)
    # out: h @ W2 + b2, tanh (EUP) and scale by bound — all f32 except MXU inputs
    a = jnp.dot(h.astype(w2_ref.dtype), w2_ref[...],
                preferred_element_type=jnp.float32)
    a = a + b2_ref[...]
    o_ref[...] = (jnp.tanh(a) * bound).astype(o_ref.dtype)


def _pick_batch_tile(batch, block_batch, sublane):
    """Choose (tile_rows, padded_batch).  Single tile for small batches,
    2-way split (v7x megacore) for mid/large batches, block_batch cap above."""
    if batch <= block_batch:
        if batch >= 4 * sublane:
            tb = _round_up((batch + 1) // 2, sublane)   # grid == 2
        else:
            tb = batch                                  # block dim == full dim
    else:
        tb = block_batch
    bp = _round_up(batch, tb)
    return tb, bp


def actor_net_forward(x, w1, b1, w2, b2, bound, *,
                      block_batch=1024, compute_dtype=jnp.bfloat16):
    """x: [B, n_states], w1: [n_states, emb], b1: [1, emb],
       w2: [emb, n_actions], b2: [1, n_actions] -> [B, n_actions] (float32).

    bound is a Python scalar (the DDPG action bound).
    # TODO(synk): a per-action bound vector would need to be passed as a
    # (1, n_actions) operand instead of a baked-in constant.
    """
    batch, n_states = x.shape
    emb = w1.shape[1]
    n_actions = w2.shape[1]
    cd = jnp.dtype(compute_dtype)

    # Cast MXU inputs only if needed (no-op when params were pre-cast once).
    if x.dtype != cd:
        x = x.astype(cd)
    if w1.dtype != cd:
        w1 = w1.astype(cd)
    if w2.dtype != cd:
        w2 = w2.astype(cd)
    b1 = b1.reshape(1, emb).astype(jnp.float32)
    b2 = b2.reshape(1, n_actions).astype(jnp.float32)

    # Batch tiling: 16-row alignment for bf16 sublane packing, 8 for f32; cap
    # the f32 tile so the f32 h intermediate stays small between the two dots.
    sublane = 16 if cd.itemsize == 2 else 8
    if cd.itemsize == 4:
        block_batch = min(block_batch, 256)
    tb, bp = _pick_batch_tile(batch, block_batch, sublane)
    grid = bp // tb

    # Only pad the batch dim, and only when the tile doesn't divide it
    # (never triggers for typical DDPG batch sizes).
    if bp != batch:
        x = jnp.pad(x, ((0, bp - batch), (0, 0)))

    kernel = functools.partial(_actor_kernel, bound=float(bound))

    # Advisory cost estimate from REAL (unpadded) dims.
    cost = pl.CostEstimate(
        flops=2 * batch * (n_states * emb + emb * n_actions),
        transcendentals=batch * n_actions,
        bytes_accessed=(batch * n_states * cd.itemsize
                        + n_states * emb * cd.itemsize + emb * 4
                        + emb * n_actions * cd.itemsize + n_actions * 4
                        + batch * n_actions * 4),
    )

    # VMEM budget from the true layout-padded resident set (Pallas
    # double-buffers every BlockSpec input, including constant-index weights);
    # clamped so it also fits comfortably in v7x's 64 MiB VMEM.
    lane = lambda n: _round_up(n, 128)
    row8 = lambda n: _round_up(n, 8)
    vmem_bytes = (
        2 * tb * lane(n_states) * cd.itemsize            # x tile (2 bufs)
        + 2 * tb * lane(n_actions) * 4                   # out tile (2 bufs)
        + 2 * (row8(n_states) * lane(emb) * cd.itemsize + lane(emb) * 4)   # w1+b1
        + 2 * (row8(emb) * lane(n_actions) * cd.itemsize + lane(n_actions) * 4)
        + tb * lane(emb) * 4)                            # h intermediate (f32)
    vmem_limit = int(min(max(2 * vmem_bytes, 8 << 20), 48 << 20))

    out = pl.pallas_call(
        kernel,
        out_shape=jax.ShapeDtypeStruct((bp, n_actions), jnp.float32),
        grid_spec=pltpu.PrefetchScalarGridSpec(
            num_scalar_prefetch=0,
            grid=(grid,),
            in_specs=[
                pl.BlockSpec((tb, n_states), lambda i: (i, 0)),    # x: batch-tiled
                pl.BlockSpec((n_states, emb), lambda i: (0, 0)),   # w1: resident
                pl.BlockSpec((1, emb), lambda i: (0, 0)),          # b1
                pl.BlockSpec((emb, n_actions), lambda i: (0, 0)),  # w2
                pl.BlockSpec((1, n_actions), lambda i: (0, 0)),    # b2
            ],
            out_specs=pl.BlockSpec((tb, n_actions), lambda i: (i, 0)),
        ),
        compiler_params=pltpu.CompilerParams(
            dimension_semantics=("parallel",),
            vmem_limit_bytes=vmem_limit,
        ),
        cost_estimate=cost,
    )(x, w1, b1, w2, b2)

    return out[:batch] if bp != batch else out


def init_actor_params(key, n_states, n_actions, emb_dim):
    """Deterministic init mimicking torch.nn.Linear default:
       U(-1/sqrt(fan_in), 1/sqrt(fan_in)) for both weight and bias."""
    k1, k2, k3, k4 = jax.random.split(key, 4)
    bnd1 = 1.0 / jnp.sqrt(n_states)
    bnd2 = 1.0 / jnp.sqrt(emb_dim)
    w1 = jax.random.uniform(k1, (n_states, emb_dim), jnp.float32, -bnd1, bnd1)
    b1 = jax.random.uniform(k2, (1, emb_dim), jnp.float32, -bnd1, bnd1)
    w2 = jax.random.uniform(k3, (emb_dim, n_actions), jnp.float32, -bnd2, bnd2)
    b2 = jax.random.uniform(k4, (1, n_actions), jnp.float32, -bnd2, bnd2)
    return w1, b1, w2, b2


def cast_actor_params(w1, b1, w2, b2, compute_dtype=jnp.bfloat16):
    """Cast the MXU-input weights once (hoisted out of the per-call forward);
    biases stay f32 for the f32 elementwise tail."""
    cd = jnp.dtype(compute_dtype)
    return w1.astype(cd), b1.astype(jnp.float32), w2.astype(cd), b2.astype(jnp.float32)


def _reference(x, w1, b1, w2, b2, bound):
    return jnp.tanh(jnp.maximum(x @ w1 + b1, 0.0) @ w2 + b2) * bound


if __name__ == "__main__":
    key = jax.random.PRNGKey(0)
    kx, kparam, kx2 = jax.random.split(key, 3)

    # Small, module-consistent shapes (DDPG actor: tiny state/action dims).
    batch, n_states, emb_dim, n_actions = 8, 16, 32, 4
    bound = 2.0

    x = jax.random.normal(kx, (batch, n_states), jnp.float32)
    w1, b1, w2, b2 = init_actor_params(kparam, n_states, n_actions, emb_dim)
    ref = _reference(x, w1, b1, w2, b2, bound)

    # Exact f32 path — tight tolerance against the pure-JAX reference.
    out_f32 = actor_net_forward(x, w1, b1, w2, b2, bound,
                                compute_dtype=jnp.float32)
    out_f32 = jax.block_until_ready(out_f32)
    assert out_f32.shape == (batch, n_actions)
    assert jnp.allclose(out_f32, ref, atol=1e-5, rtol=1e-5)

    # Default bf16 MXU-input path (weights pre-cast once, f32 accumulation);
    # tolerance relaxed for bf16 matmul inputs.
    w1_c, b1_c, w2_c, b2_c = cast_actor_params(w1, b1, w2, b2)
    out_bf16 = actor_net_forward(x, w1_c, b1_c, w2_c, b2_c, bound)
    out_bf16 = jax.block_until_ready(out_bf16)
    assert out_bf16.shape == (batch, n_actions)
    assert jnp.allclose(out_bf16, ref, atol=5e-2, rtol=5e-2)

    # Larger batch exercises the 2-tile grid (both v7x TensorCores busy).
    big_batch = 1024
    x_big = jax.random.normal(kx2, (big_batch, n_states), jnp.float32)
    out_big = actor_net_forward(x_big, w1_c, b1_c, w2_c, b2_c, bound)
    out_big = jax.block_until_ready(out_big)
    ref_big = _reference(x_big, w1, b1, w2, b2, bound)
    assert out_big.shape == (big_batch, n_actions)
    assert jnp.allclose(out_big, ref_big, atol=5e-2, rtol=5e-2)

    print("KERNEL_OK")
</pallas_src>

<mosaic_0001>
module attributes {stable_mosaic.version = 11 : i64} {
  func.func @_actor_kernel(%arg0: i32, %arg1: memref<8x16xf32, #tpu.memory_space<vmem>>, %arg2: memref<16x32xf32, #tpu.memory_space<vmem>>, %arg3: memref<1x32xf32, #tpu.memory_space<vmem>>, %arg4: memref<32x4xf32, #tpu.memory_space<vmem>>, %arg5: memref<1x4xf32, #tpu.memory_space<vmem>>, %arg6: memref<8x4xf32, #tpu.memory_space<vmem>>) attributes {dimension_semantics = [#tpu.dimension_semantics<parallel>], iteration_bounds = array<i64: 1>, scalar_prefetch = 0 : i64, scratch_operands = 0 : i64, tpu.core_type = #tpu.core_type<tc>, window_params = [{transform_indices = @transform_0, window_bounds = array<i64: 8, 16>}, {pipeline_mode = #tpu.pipeline_mode<synchronous>, transform_indices = @transform_1, window_bounds = array<i64: 16, 32>}, {pipeline_mode = #tpu.pipeline_mode<synchronous>, transform_indices = @transform_2, window_bounds = array<i64: 1, 32>}, {pipeline_mode = #tpu.pipeline_mode<synchronous>, transform_indices = @transform_3, window_bounds = array<i64: 32, 4>}, {pipeline_mode = #tpu.pipeline_mode<synchronous>, transform_indices = @transform_4, window_bounds = array<i64: 1, 4>}, {transform_indices = @transform_5, window_bounds = array<i64: 8, 4>}]} {
    %c0 = arith.constant 0 : index
    %c0_0 = arith.constant 0 : index
    %0 = vector.load %arg1[%c0, %c0_0] : memref<8x16xf32, #tpu.memory_space<vmem>>, vector<8x16xf32>
    %c0_1 = arith.constant 0 : index
    %c0_2 = arith.constant 0 : index
    %1 = vector.load %arg2[%c0_1, %c0_2] : memref<16x32xf32, #tpu.memory_space<vmem>>, vector<16x32xf32>
    %cst = arith.constant dense<0.000000e+00> : vector<8x32xf32>
    %2 = tpu.matmul %0, %1, %cst {dimension_numbers = #tpu.dot_dimension_numbers<[1], [0], [0], [1], [0, 0, 1, 1], [], []>} : vector<8x16xf32>, vector<16x32xf32>, vector<8x32xf32> -> vector<8x32xf32>
    %c0_3 = arith.constant 0 : index
    %c0_4 = arith.constant 0 : index
    %3 = vector.load %arg3[%c0_3, %c0_4] : memref<1x32xf32, #tpu.memory_space<vmem>>, vector<1x32xf32>
    %4 = vector.broadcast %3 : vector<1x32xf32> to vector<8x32xf32>
    %5 = arith.addf %2, %4 : vector<8x32xf32>
    %cst_5 = arith.constant 0.000000e+00 : f32
    %6 = vector.broadcast %cst_5 : f32 to vector<8x32xf32>
    %7 = arith.maximumf %5, %6 : vector<8x32xf32>
    %c0_6 = arith.constant 0 : index
    %c0_7 = arith.constant 0 : index
    %8 = vector.load %arg4[%c0_6, %c0_7] : memref<32x4xf32, #tpu.memory_space<vmem>>, vector<32x4xf32>
    %cst_8 = arith.constant dense<0.000000e+00> : vector<8x4xf32>
    %9 = tpu.matmul %7, %8, %cst_8 {dimension_numbers = #tpu.dot_dimension_numbers<[1], [0], [0], [1], [0, 0, 1, 1], [], []>} : vector<8x32xf32>, vector<32x4xf32>, vector<8x4xf32> -> vector<8x4xf32>
    %c0_9 = arith.constant 0 : index
    %c0_10 = arith.constant 0 : index
    %10 = vector.load %arg5[%c0_9, %c0_10] : memref<1x4xf32, #tpu.memory_space<vmem>>, vector<1x4xf32>
    %11 = vector.broadcast %10 : vector<1x4xf32> to vector<8x4xf32>
    %12 = arith.addf %9, %11 : vector<8x4xf32>
    %13 = math.tanh %12 : vector<8x4xf32>
    %cst_11 = arith.constant 2.000000e+00 : f32
    %14 = vector.broadcast %cst_11 : f32 to vector<8x4xf32>
    %15 = arith.mulf %13, %14 : vector<8x4xf32>
    %c0_12 = arith.constant 0 : index
    %c0_13 = arith.constant 0 : index
    %16 = vector.load %arg6[%c0_12, %c0_13] : memref<8x4xf32, #tpu.memory_space<vmem>>, vector<8x4xf32>
    tpu.vector_store %arg6[%c0_12, %c0_13], %15 {strides = array<i32>} : memref<8x4xf32, #tpu.memory_space<vmem>>, vector<8x4xf32>,
    return
  }
  func.func @transform_0(%arg0: i32) -> (i32, i32) {
    %c0_i32 = arith.constant 0 : i32
    %c0_i32_0 = arith.constant 0 : i32
    return %arg0, %c0_i32 : i32, i32
  }
  func.func @transform_1(%arg0: i32) -> (i32, i32) {
    %c0_i32 = arith.constant 0 : i32
    %c0_i32_0 = arith.constant 0 : i32
    %c0_i32_1 = arith.constant 0 : i32
    return %c0_i32, %c0_i32_0 : i32, i32
  }
  func.func @transform_2(%arg0: i32) -> (i32, i32) {
    %c0_i32 = arith.constant 0 : i32
    %c0_i32_0 = arith.constant 0 : i32
    %c0_i32_1 = arith.constant 0 : i32
    return %c0_i32, %c0_i32_0 : i32, i32
  }
  func.func @transform_3(%arg0: i32) -> (i32, i32) {
    %c0_i32 = arith.constant 0 : i32
    %c0_i32_0 = arith.constant 0 : i32
    %c0_i32_1 = arith.constant 0 : i32
    return %c0_i32, %c0_i32_0 : i32, i32
  }
  func.func @transform_4(%arg0: i32) -> (i32, i32) {
    %c0_i32 = arith.constant 0 : i32
    %c0_i32_0 = arith.constant 0 : i32
    %c0_i32_1 = arith.constant 0 : i32
    return %c0_i32, %c0_i32_0 : i32, i32
  }
  func.func @transform_5(%arg0: i32) -> (i32, i32) {
    %c0_i32 = arith.constant 0 : i32
    %c0_i32_0 = arith.constant 0 : i32
    return %arg0, %c0_i32 : i32, i32
  }
}

</mosaic_0001>

<bundles_post_ra>
// kernel: tpu_custom_call.1
= control target key start
LH: loop header
LB: loop body
LE: loop exit
PB: predicated region body
PF: predicated region fallthrough
CT: control target
= control target key end

     0   :  { %v242_v0 = vmov 0.0|0.0   ;;  %vm243_vm0 = vmmov 0   ;;  %v244_v3 = vmov 0.0   ;;  %vm30_vm1 = vcmask 130048   ;;  %s305_s1 = inlined_call_operand.vmem [shape: f32[16,32], index: 1, kind: input, shape index: {}]   ;;  %s306_s3 = inlined_call_operand.vmem [shape: f32[32,4], index: 3, kind: input, shape index: {}]   ;;  %s307_s0 = inlined_call_operand.vmem [shape: f32[8,16], index: 0, kind: input, shape index: {}]   ;;  %s308_s2 = inlined_call_operand.vmem [shape: f32[1,32], index: 2, kind: input, shape index: {}]   ;;  %s309_s4 = inlined_call_operand.vmem [shape: f32[1,4], index: 4, kind: input, shape index: {}]   ;;  %s310_s5 = inlined_call_operand.vmem [shape: f32[8,4], index: 5, kind: output, shape index: {}]  }
   0x1   :  { %228 = vmatprep.subr.bf16.mxu0 %v242_v0  ;;  %v21_v1 = vld [vmem:[%s305_s1] sm:$0xff]  ;;  %v22_v2 = vld [vmem:[%s305_s1 + $0x8] sm:$0xff]  ;;  %214 = vmatprep.mubr.msk.f32.mxu0 %vm243_vm0, %v244_v3  ;;  %v107_v9 = vld [vmem:[%s306_s3 + $0x10] sm:$0xff]  ;;  %vm116_vm2 = vcmask 261120   ;;  %vm192_vm3 = vcmask 31744  }
   0x2   :  { %v229_v4 = vpack.c.bf16 %v22_v2, %v21_v1  ;;  %231 = vmatprep.subr.bf16.mxu1 %v242_v0  ;;  %v105_v5 = vld [vmem:[%s306_s3] sm:$0xff]  ;;  %v106_v6 = vld [vmem:[%s306_s3 + $0x8] sm:$0xff]  ;;  %225 = vmatprep.mubr.msk.f32.mxu1 %vm243_vm0, %v244_v3  ;;  %v108_v10 = vld [vmem:[%s306_s3 + $0x18] sm:$0xff] }
   0x3   :  { %v232_v7 = vpack.c.bf16 %v106_v6, %v105_v5  ;;  %v20_v8 = vld [vmem:[%s307_s0] sm:$0xff]  ;;  %v235_v11 = vpack.c.bf16 %v108_v10, %v107_v9 }
   0x4   :  { %230 = vmatpush3.bf16.msra.mxu0 %v229_v4  ;;  %v198_v12 = vld [vmem:[%s308_s2] ss:$0 sm:$0xff] }
   0x5   :  { %233 = vmatpush3.bf16.msra.mxu1 %v232_v7  ;;  %v200_v17 = vld [vmem:[%s309_s4] ss:$0 sm:$0xff] }
   0x6   :  { %234 = vmatprep.subr.bf16.mxu1 %v242_v0 }
   0x7   :  { %215 = vmatmul.mubr.msk.f32.vlgmr.msra.gmra.mrb[0].mxu0 %vm30_vm1, %v20_v8 }
   0x9   :  { %236 = vmatpush3.bf16.msra.mxu1 %v235_v11 }
  0xda   :  { %v100_v13 = vpop.f32.mrb[0].mxu0 }
  0xdb   :  { %v101_v14 = vadd.f32 %v198_v12, %v100_v13  ;;  %v216_v15 = vpop.f32.mrb[1].mxu0 }
  0xdd   :  { %v104_v16 = vmax.f32 %v101_v14, 0.0 }
  0xdf   :  { %226 = vmatmul.mubr.msk.f32.vlgmr.msra.gmra.mrb[0].mxu1 %vm116_vm2, %v104_v16 }
 0x1b2   :  { %v186_v18 = vpop.f32.mrb[0].mxu1 }
 0x1b3   :  { %v187_v19 = vadd.f32 %v200_v17, %v186_v18  ;;  %v227_v20 = vpop.f32.mrb[1].mxu1 }
 0x1b5   :  { %240 = vtanh.f32 %v187_v19 }
 0x1bf   :  { %v241_v21 = vpop.eup %240 }
 0x1c0   :  { %v191_v22 = vmul.f32 2.0, %v241_v21 }
 0x1c2   :  { %193 = vst.msk [vmem:[%s310_s5] sm:$0xff] %vm192_vm3, %v191_v22 }

</bundles_post_ra>
